<compile_context>
chip_gen: v5e
topology: v5e:2x2
jax: 0.10.0
libtpu: 0.0.40
codegen_flags: <defaults>
</compile_context>

<pallas_src>
import functools

import jax
import jax.numpy as jnp
from jax.experimental import pallas as pl
from jax.experimental.pallas import tpu as pltpu


# ----------------------------------------------------------------------------
# Model-wide constants
# ----------------------------------------------------------------------------
N_BANDS = 128
FB_TAPS = 15          # odd kernel -> "same" length with padding = 7
LEAKY_SLOPE = 0.2

MAIN_CH = [(N_BANDS, 256), (256, 256), (256, 512), (512, 512),
           (512, 1024), (1024, 1024), (1024, 1024), (1024, 1024)]
MED_CH = [(128, 256), (256, 512), (512, 1024)]
LOW_CH = [(32, 64), (64, 128), (128, 256)]

# double-buffered bf16 B-tile budget for the whole-K decision (safe on v7x)
_WHOLE_K_BYTE_BUDGET = 16 * 1024 * 1024


def _round_up(x, m):
    return ((x + m - 1) // m) * m


def _choose_kn_tiles(k_flat, n):
    """Padded sizes + tile sizes for the K (reduction) and N (C_out) dims."""
    np_ = _round_up(max(n, 1), 128)
    # TN = 512 -> the 1024-wide convs keep 2 N blocks (v7x megacore); smaller N
    # takes the full (128-aligned) extent so the N grid never explodes.
    tn = 512 if (np_ >= 512 and np_ % 512 == 0) else np_
    kp16 = _round_up(max(k_flat, 1), 16)        # no padding of K up to 128
    if 2 * kp16 * tn * 2 <= _WHOLE_K_BYTE_BUDGET:
        kp, tk = kp16, kp16                      # whole-K: no reduction grid axis
    else:                                        # generic fallback (unused here)
        tk = 2048
        kp = _round_up(k_flat, tk)
    return kp, tk, np_, tn


# ----------------------------------------------------------------------------
# Pallas kernels: matmul + bias + optional leaky_relu(0.2)
# ----------------------------------------------------------------------------
def _mm_bias_act_single_k(a_ref, b_ref, bias_ref, o_ref, *, apply_act, slope):
    y = jnp.dot(a_ref[...], b_ref[...], preferred_element_type=jnp.float32)
    y = y + bias_ref[...]
    if apply_act:
        y = jnp.where(y >= 0.0, y, y * slope)
    o_ref[...] = y.astype(o_ref.dtype)


def _mm_bias_act_multi_k(a_ref, b_ref, bias_ref, o_ref, acc_ref, *, apply_act, slope):
    @pl.when(pl.program_id(2) == 0)
    def _():
        acc_ref[...] = jnp.zeros_like(acc_ref)

    acc_ref[...] += jnp.dot(a_ref[...], b_ref[...], preferred_element_type=jnp.float32)

    @pl.when(pl.program_id(2) == pl.num_programs(2) - 1)
    def _():
        y = acc_ref[...] + bias_ref[...]
        if apply_act:
            y = jnp.where(y >= 0.0, y, y * slope)
        o_ref[...] = y.astype(o_ref.dtype)


def matmul_bias_act(a, b_pad, bias_pad, apply_act, slope=LEAKY_SLOPE):
    """a: (M, K_flat) f32, b_pad: (Kp, Np) bf16, bias_pad: (1, Np) f32 -> (M, Np) f32."""
    m, k_flat = a.shape
    kp, np_ = b_pad.shape
    _, tk, _, tn = _choose_kn_tiles(kp, np_)   # idempotent on already-padded sizes

    # M is tiny (B * L_out); take the whole (8-aligned) extent as one tile.
    if m <= 512:
        mp = _round_up(max(m, 8), 8)
        tm = mp
    else:
        tm = 256
        mp = _round_up(m, tm)

    a_pad = jnp.pad(a.astype(jnp.bfloat16), ((0, mp - m), (0, kp - k_flat)))

    n_k = kp // tk
    est = 2 * (tm * tk * 2 + tk * tn * 2 + tm * tn * 4 + tn * 4) + tm * tn * 4
    vmem_limit = int(min(max(2 * est, 32 * 1024 * 1024), 48 * 1024 * 1024))

    if n_k == 1:
        kernel = functools.partial(_mm_bias_act_single_k,
                                   apply_act=apply_act, slope=slope)
        grid = (mp // tm, np_ // tn)
        in_specs = [
            pl.BlockSpec((tm, kp), lambda i, j: (i, 0)),
            pl.BlockSpec((kp, tn), lambda i, j: (0, j)),
            pl.BlockSpec((1, tn), lambda i, j: (0, j)),
        ]
        out_specs = pl.BlockSpec((tm, tn), lambda i, j: (i, j))
        scratch = []
        dims = ("parallel", "parallel")
    else:
        kernel = functools.partial(_mm_bias_act_multi_k,
                                   apply_act=apply_act, slope=slope)
        grid = (mp // tm, np_ // tn, n_k)
        in_specs = [
            pl.BlockSpec((tm, tk), lambda i, j, k: (i, k)),
            pl.BlockSpec((tk, tn), lambda i, j, k: (k, j)),
            pl.BlockSpec((1, tn), lambda i, j, k: (0, j)),
        ]
        out_specs = pl.BlockSpec((tm, tn), lambda i, j, k: (i, j))
        scratch = [pltpu.VMEM((tm, tn), jnp.float32)]
        dims = ("parallel", "parallel", "arbitrary")

    out = pl.pallas_call(
        kernel,
        out_shape=jax.ShapeDtypeStruct((mp, np_), jnp.float32),
        grid_spec=pltpu.PrefetchScalarGridSpec(
            num_scalar_prefetch=0,
            grid=grid,
            in_specs=in_specs,
            out_specs=out_specs,
            scratch_shapes=scratch,
        ),
        compiler_params=pltpu.CompilerParams(
            dimension_semantics=dims, vmem_limit_bytes=vmem_limit),
    )(a_pad, b_pad, bias_pad)
    return out[:m, :]


# ----------------------------------------------------------------------------
# Conv1d = channels-last im2col (static strided slices) + Pallas matmul kernel
# ----------------------------------------------------------------------------
def conv1d_cl(x_cl, w_pad, bias_pad, c_out, k, stride, padding, apply_act):
    """x_cl: (B, L, C_in) channels-last -> (B, L_out, C_out) channels-last."""
    b, l, c_in = x_cl.shape
    l_p = l + 2 * padding
    l_out = (l_p - k) // stride + 1
    x_pad = jnp.pad(x_cl, ((0, 0), (padding, padding), (0, 0)))

    # K static strided slices instead of a fancy-index gather.
    cols = [x_pad[:, tap:tap + stride * (l_out - 1) + 1:stride, :] for tap in range(k)]
    patches = jnp.stack(cols, axis=-1)                 # (B, L_out, C_in, K)
    patches = patches.reshape(b * l_out, c_in * k)     # matches torch (C_out, C_in*K) flatten

    out = matmul_bias_act(patches, w_pad, bias_pad, apply_act)   # (B*L_out, Np)
    return out[:, :c_out].reshape(b, l_out, c_out)


def judge_conv_cl(h_cl, w, bias):
    """C_out=1 'judge' conv: too small for the MXU, use plain einsum.

    h_cl: (B, L, C_in), w: (1, C_in, K), bias: (1,) -> NCW output (B, 1, L_out)."""
    _, c_in, k = w.shape
    pad = k // 2
    b, l, _ = h_cl.shape
    l_out = l + 2 * pad - k + 1
    h_pad = jnp.pad(h_cl, ((0, 0), (pad, pad), (0, 0)))
    out = jnp.full((b, l_out), bias[0], jnp.float32)
    for tap in range(k):
        out = out + jnp.einsum("blc,c->bl", h_pad[:, tap:tap + l_out, :], w[0, :, tap])
    return out[:, None, :]


# ----------------------------------------------------------------------------
# Parameters (raw, PyTorch-shaped) + one-time preparation (pad/transpose/bf16)
# ----------------------------------------------------------------------------
def init_conv(key, c_in, c_out, k):
    # PyTorch default Conv1d init: U(-1/sqrt(fan_in), 1/sqrt(fan_in))
    wkey, bkey = jax.random.split(key)
    bound = 1.0 / jnp.sqrt(jnp.float32(c_in * k))
    w = jax.random.uniform(wkey, (c_out, c_in, k), jnp.float32, -bound, bound)
    b = jax.random.uniform(bkey, (c_out,), jnp.float32, -bound, bound)
    return w, b


def make_params(key):
    keys = iter(jax.random.split(key, 32))
    params = {}
    params["fb"] = init_conv(next(keys), 1, N_BANDS, FB_TAPS)
    params["main"] = [init_conv(next(keys), ci, co, 7) for ci, co in MAIN_CH]
    params["judge"] = init_conv(next(keys), 1024, 1, 3)
    params["medium"] = {
        "convs": [init_conv(next(keys), ci, co, 7) for ci, co in MED_CH],
        "judge": init_conv(next(keys), 1024, 1, 3),
    }
    params["low"] = {
        "convs": [init_conv(next(keys), ci, co, 7) for ci, co in LOW_CH],
        "judge": init_conv(next(keys), 256, 1, 3),
    }
    return params


def _prep_conv(w, b):
    """(C_out, C_in, K) f32 -> pre-transposed / pre-padded bf16 weight + f32 bias."""
    c_out, c_in, k = w.shape
    k_flat = c_in * k
    kp, _, np_, _ = _choose_kn_tiles(k_flat, c_out)
    w2 = w.reshape(c_out, k_flat).T.astype(jnp.bfloat16)          # (K_flat, C_out)
    w_pad = jnp.pad(w2, ((0, kp - k_flat), (0, np_ - c_out)))     # (Kp, Np) bf16
    b_pad = jnp.pad(b.astype(jnp.float32)[None, :], ((0, 0), (0, np_ - c_out)))
    return w_pad, b_pad


def prepare_params(raw):
    return {
        "fb": _prep_conv(*raw["fb"]),
        "main": [_prep_conv(w, b) for (w, b) in raw["main"]],
        "judge": raw["judge"],
        "medium": {"convs": [_prep_conv(w, b) for (w, b) in raw["medium"]["convs"]],
                   "judge": raw["medium"]["judge"]},
        "low": {"convs": [_prep_conv(w, b) for (w, b) in raw["low"]["convs"]],
                "judge": raw["low"]["judge"]},
    }


# ----------------------------------------------------------------------------
# Forward pass (channels-last internally; NCW only at the API boundary)
# ----------------------------------------------------------------------------
def full_resolution(bands_cl, prep):
    features = []
    h = bands_cl
    for idx, (_, co) in enumerate(MAIN_CH):
        w_pad, b_pad = prep["main"][idx]
        h = conv1d_cl(h, w_pad, b_pad, co, k=7, stride=2, padding=3, apply_act=True)
        features.append(jnp.transpose(h, (0, 2, 1)))   # NCW for API fidelity
    jw, jb = prep["judge"]
    j = judge_conv_cl(h, jw, jb)
    return features, j


def low_res_spectrogram_disc(bands_cl, sub_prep, ch_list, freq_bins, time_steps,
                             log_scaling=False):
    b, t, n_bands = bands_cl.shape
    fp = n_bands // freq_bins
    tp = t // time_steps
    spec = bands_cl.reshape(b, time_steps, tp, freq_bins, fp).mean(axis=(2, 4))
    if log_scaling:
        spec = jnp.log(jnp.abs(spec) + 1e-8)  # TODO(synk): exact log scaling unknown
    features = []
    h = spec                                            # (B, time_steps, freq_bins) CL
    for idx, (_, co) in enumerate(ch_list):
        w_pad, b_pad = sub_prep["convs"][idx]
        h = conv1d_cl(h, w_pad, b_pad, co, k=7, stride=2, padding=3, apply_act=True)
        features.append(jnp.transpose(h, (0, 2, 1)))
    jw, jb = sub_prep["judge"]
    j = judge_conv_cl(h, jw, jb)
    return features, j


def filter_bank_discriminator_forward(prep, x, feat):
    # x: (B, 1, T) raw audio; feat unused (conditioning_channels = 0).
    del feat
    x_cl = jnp.transpose(x, (0, 2, 1))                  # (B, T, 1) channels-last
    fbw, fbb = prep["fb"]
    bands_cl = conv1d_cl(x_cl, fbw, fbb, N_BANDS, FB_TAPS, stride=1,
                         padding=FB_TAPS // 2, apply_act=False)   # (B, T, n_bands)

    features, judgements = [], []

    f, j = full_resolution(bands_cl, prep)
    features.append(f)
    judgements.append(j)

    f, j = low_res_spectrogram_disc(bands_cl, prep["medium"], MED_CH,
                                    freq_bins=128, time_steps=128)
    features.append(f)
    judgements.append(j)

    f, j = low_res_spectrogram_disc(bands_cl, prep["low"], LOW_CH,
                                    freq_bins=32, time_steps=32)
    features.append(f)
    judgements.append(j)

    return features, judgements


# ----------------------------------------------------------------------------
# Main
# ----------------------------------------------------------------------------
if __name__ == "__main__":
    key = jax.random.PRNGKey(0)
    xkey, fkey, pkey = jax.random.split(key, 3)

    B, T = 2, 256
    x = jax.random.normal(xkey, (B, 1, T), jnp.float32)
    feat = jax.random.normal(fkey, (B, 8, 32), jnp.float32)  # ignored (cond=0)

    raw_params = make_params(pkey)
    prep = prepare_params(raw_params)

    # Correctness check: Pallas channels-last conv vs lax reference (filter bank).
    # Tolerance is loosened because operands are cast to bf16 (f32 accumulation).
    fbw_raw, fbb_raw = raw_params["fb"]
    x_cl = jnp.transpose(x, (0, 2, 1))
    bands_cl = conv1d_cl(x_cl, prep["fb"][0], prep["fb"][1], N_BANDS, FB_TAPS,
                         stride=1, padding=FB_TAPS // 2, apply_act=False)
    bands_pallas = jnp.transpose(bands_cl, (0, 2, 1))
    bands_ref = jax.lax.conv_general_dilated(
        x, fbw_raw, window_strides=(1,), padding=((7, 7),),
        dimension_numbers=("NCH", "OIH", "NCH")) + fbb_raw[None, :, None]
    assert jnp.allclose(bands_pallas, bands_ref, atol=5e-2, rtol=5e-2), \
        "Pallas conv1d mismatch vs lax reference"

    fwd = jax.jit(filter_bank_discriminator_forward)
    features, judgements = fwd(prep, x, feat)
    jax.block_until_ready((features, judgements))

    # sanity: judgement shapes (B,1,1), (B,1,16), (B,1,4)
    assert judgements[0].shape == (B, 1, 1)
    assert judgements[1].shape == (B, 1, 16)
    assert judgements[2].shape == (B, 1, 4)
    assert len(features[0]) == 8 and len(features[1]) == 3 and len(features[2]) == 3
    assert features[0][0].shape == (B, 256, 128)

    print("KERNEL_OK")
</pallas_src>

<mosaic_0001>
module attributes {stable_mosaic.version = 11 : i64} {
  func.func @_mm_bias_act_single_k(%arg0: i32, %arg1: i32, %arg2: memref<512x16xbf16, #tpu.memory_space<vmem>>, %arg3: memref<16x128xbf16, #tpu.memory_space<vmem>>, %arg4: memref<1x128xf32, #tpu.memory_space<vmem>>, %arg5: memref<512x128xf32, #tpu.memory_space<vmem>>) attributes {dimension_semantics = [#tpu.dimension_semantics<parallel>, #tpu.dimension_semantics<parallel>], iteration_bounds = array<i64: 1, 1>, scalar_prefetch = 0 : i64, scratch_operands = 0 : i64, tpu.core_type = #tpu.core_type<tc>, window_params = [{transform_indices = @transform_0, window_bounds = array<i64: 512, 16>}, {transform_indices = @transform_1, window_bounds = array<i64: 16, 128>}, {transform_indices = @transform_2, window_bounds = array<i64: 1, 128>}, {transform_indices = @transform_3, window_bounds = array<i64: 512, 128>}]} {
    %c0 = arith.constant 0 : index
    %c0_0 = arith.constant 0 : index
    %0 = vector.load %arg2[%c0, %c0_0] : memref<512x16xbf16, #tpu.memory_space<vmem>>, vector<512x16xbf16>
    %c0_1 = arith.constant 0 : index
    %c0_2 = arith.constant 0 : index
    %1 = vector.load %arg3[%c0_1, %c0_2] : memref<16x128xbf16, #tpu.memory_space<vmem>>, vector<16x128xbf16>
    %cst = arith.constant dense<0.000000e+00> : vector<512x128xf32>
    %2 = tpu.matmul %0, %1, %cst {dimension_numbers = #tpu.dot_dimension_numbers<[1], [0], [0], [1], [0, 0, 1, 1], [], []>} : vector<512x16xbf16>, vector<16x128xbf16>, vector<512x128xf32> -> vector<512x128xf32>
    %c0_3 = arith.constant 0 : index
    %c0_4 = arith.constant 0 : index
    %3 = vector.load %arg4[%c0_3, %c0_4] : memref<1x128xf32, #tpu.memory_space<vmem>>, vector<1x128xf32>
    %4 = vector.broadcast %3 : vector<1x128xf32> to vector<512x128xf32>
    %5 = arith.addf %2, %4 : vector<512x128xf32>
    %c0_5 = arith.constant 0 : index
    %c0_6 = arith.constant 0 : index
    %6 = vector.load %arg5[%c0_5, %c0_6] : memref<512x128xf32, #tpu.memory_space<vmem>>, vector<512x128xf32>
    tpu.vector_store %arg5[%c0_5, %c0_6], %5 {strides = array<i32>} : memref<512x128xf32, #tpu.memory_space<vmem>>, vector<512x128xf32>,
    return
  }
  func.func @transform_0(%arg0: i32, %arg1: i32) -> (i32, i32) {
    %c0_i32 = arith.constant 0 : i32
    %c0_i32_0 = arith.constant 0 : i32
    return %arg0, %c0_i32 : i32, i32
  }
  func.func @transform_1(%arg0: i32, %arg1: i32) -> (i32, i32) {
    %c0_i32 = arith.constant 0 : i32
    %c0_i32_0 = arith.constant 0 : i32
    return %c0_i32, %arg1 : i32, i32
  }
  func.func @transform_2(%arg0: i32, %arg1: i32) -> (i32, i32) {
    %c0_i32 = arith.constant 0 : i32
    %c0_i32_0 = arith.constant 0 : i32
    return %c0_i32, %arg1 : i32, i32
  }
  func.func @transform_3(%arg0: i32, %arg1: i32) -> (i32, i32) {
    %c0_i32 = arith.constant 0 : i32
    return %arg0, %arg1 : i32, i32
  }
}

</mosaic_0001>

<bundles_post_ra>
// kernel: tpu_custom_call.1
= control target key start
LH: loop header
LB: loop body
LE: loop exit
PB: predicated region body
PF: predicated region fallthrough
CT: control target
= control target key end

     0   :  { %vm252_vm0 = vcmask 130048   ;;  %s1056_s0 = inlined_call_operand.vmem [shape: bf16[512,16], index: 0, kind: input, shape index: {}]   ;;  %s1057_s1 = inlined_call_operand.vmem [shape: bf16[16,128], index: 1, kind: input, shape index: {}]   ;;  %s1058_s2 = inlined_call_operand.vmem [shape: f32[1,128], index: 2, kind: input, shape index: {}]   ;;  %s1059_s3 = inlined_call_operand.hbm [shape: f32[512,128], index: 3, kind: output, shape index: {}]  }
   0x1   :  { %v796_v0 = vld [vmem:[%s1057_s1] sm:$0xff] }
   0x2   :  { %v764_v1 = vld [vmem:[%s1056_s0] sm:$0xff]  ;;  %356 = vmatpush.bf16.msra.mxu0 %v796_v0  ;;  %797 = vmatpush.bf16.msra.mxu1 %v796_v0 }
   0x3   :  { %v772_v2 = vld [vmem:[%s1056_s0 + $0x40] sm:$0xff]  ;;  %798 = vmatpush.bf16.msra.mxu2 %v796_v0  ;;  %799 = vmatpush.bf16.msra.mxu3 %v796_v0 }
   0x4   :  { %v780_v3 = vld [vmem:[%s1056_s0 + $0x80] sm:$0xff] }
   0x5   :  { %v788_v4 = vld [vmem:[%s1056_s0 + $0xc0] sm:$0xff] }
   0x6   :  { %8 = vsyncpa [#allocation3], 0  ;;  %732 = vmatmul.msk.bf16.vlgmr.msra.gmra.mxu0 %vm252_vm0, %v764_v1  ;;  %740 = vmatmul.msk.bf16.vlgmr.msra.gmra.mxu1 %vm252_vm0, %v772_v2  ;;  %v765_v5 = vld [vmem:[%s1056_s0 + $0x8] sm:$0xff]  ;;  %v766_v9 = vld [vmem:[%s1056_s0 + $0x10] sm:$0xff]  ;;  %s588_s25 = sshll.u32 %s1059_s3, 4  ;;  %s831_s26 = smov 128   ;;  %s589_s25 = int_to_ptr.hbm [resolvable:$true] %s588_s25 }
   0x7   :  { %748 = vmatmul.msk.bf16.vlgmr.msra.gmra.mxu2 %vm252_vm0, %v780_v3  ;;  %756 = vmatmul.msk.bf16.vlgmr.msra.gmra.mxu3 %vm252_vm0, %v788_v4  ;;  %v773_v6 = vld [vmem:[%s1056_s0 + $0x48] sm:$0xff]  ;;  %v774_v10 = vld [vmem:[%s1056_s0 + $0x50] sm:$0xff]  ;;  %v767_v13 = vld [vmem:[%s1056_s0 + $0x18] sm:$0xff]  ;;  %s832_s27 = smov 8  }
   0x8   :  { %v781_v7 = vld [vmem:[%s1056_s0 + $0x88] sm:$0xff]  ;;  %v782_v11 = vld [vmem:[%s1056_s0 + $0x90] sm:$0xff]  ;;  %v775_v14 = vld [vmem:[%s1056_s0 + $0x58] sm:$0xff] }
   0x9   :  { %v789_v8 = vld [vmem:[%s1056_s0 + $0xc8] sm:$0xff]  ;;  %v790_v12 = vld [vmem:[%s1056_s0 + $0xd0] sm:$0xff]  ;;  %v783_v15 = vld [vmem:[%s1056_s0 + $0x98] sm:$0xff] }
   0xa   :  { %v791_v16 = vld [vmem:[%s1056_s0 + $0xd8] sm:$0xff]  ;;  %v768_v17 = vld [vmem:[%s1056_s0 + $0x20] sm:$0xff]  ;;  %v769_v21 = vld [vmem:[%s1056_s0 + $0x28] sm:$0xff] }
   0xb   :  { %v776_v18 = vld [vmem:[%s1056_s0 + $0x60] sm:$0xff]  ;;  %v777_v22 = vld [vmem:[%s1056_s0 + $0x68] sm:$0xff]  ;;  %v770_v25 = vld [vmem:[%s1056_s0 + $0x30] sm:$0xff] }
   0xc   :  { %v784_v19 = vld [vmem:[%s1056_s0 + $0xa0] sm:$0xff]  ;;  %v785_v23 = vld [vmem:[%s1056_s0 + $0xa8] sm:$0xff]  ;;  %v778_v26 = vld [vmem:[%s1056_s0 + $0x70] sm:$0xff] }
   0xd   :  { %v792_v20 = vld [vmem:[%s1056_s0 + $0xe0] sm:$0xff]  ;;  %v793_v24 = vld [vmem:[%s1056_s0 + $0xe8] sm:$0xff]  ;;  %v786_v27 = vld [vmem:[%s1056_s0 + $0xb0] sm:$0xff] }
   0xe   :  { %v794_v28 = vld [vmem:[%s1056_s0 + $0xf0] sm:$0xff]  ;;  %v771_v29 = vld [vmem:[%s1056_s0 + $0x38] sm:$0xff]  ;;  %v987_v33 = vld [vmem:[%s1058_s2] ss:$0 sm:$0xff] }
   0xf   :  { %v779_v30 = vld [vmem:[%s1056_s0 + $0x78] sm:$0xff] }
  0x10   :  { %v787_v31 = vld [vmem:[%s1056_s0 + $0xb8] sm:$0xff] }
  0x11   :  { %v795_v32 = vld [vmem:[%s1056_s0 + $0xf8] sm:$0xff]  ;;  %s830_s0 = smov [#allocation2]  }
  0x12   :  { %s586_s2 = sshll.u32 %s830_s0, 4  ;;  %s587_s2 = int_to_ptr.vmem [resolvable:$true] %s586_s2 }
  0x16   :  { %733 = vmatmul.msk.bf16.gmra.mxu0 %vm252_vm0, %v765_v5  ;;  %741 = vmatmul.msk.bf16.gmra.mxu1 %vm252_vm0, %v773_v6 }
  0x17   :  { %749 = vmatmul.msk.bf16.gmra.mxu2 %vm252_vm0, %v781_v7  ;;  %757 = vmatmul.msk.bf16.gmra.mxu3 %vm252_vm0, %v789_v8 }
  0x26   :  { %734 = vmatmul.msk.bf16.gmra.mxu0 %vm252_vm0, %v766_v9  ;;  %742 = vmatmul.msk.bf16.gmra.mxu1 %vm252_vm0, %v774_v10 }
  0x27   :  { %750 = vmatmul.msk.bf16.gmra.mxu2 %vm252_vm0, %v782_v11  ;;  %758 = vmatmul.msk.bf16.gmra.mxu3 %vm252_vm0, %v790_v12 }
  0x36   :  { %735 = vmatmul.msk.bf16.gmra.mxu0 %vm252_vm0, %v767_v13  ;;  %743 = vmatmul.msk.bf16.gmra.mxu1 %vm252_vm0, %v775_v14 }
  0x37   :  { %751 = vmatmul.msk.bf16.gmra.mxu2 %vm252_vm0, %v783_v15  ;;  %759 = vmatmul.msk.bf16.gmra.mxu3 %vm252_vm0, %v791_v16 }
  0x46   :  { %736 = vmatmul.msk.bf16.gmra.mxu0 %vm252_vm0, %v768_v17  ;;  %744 = vmatmul.msk.bf16.gmra.mxu1 %vm252_vm0, %v776_v18 }
  0x47   :  { %752 = vmatmul.msk.bf16.gmra.mxu2 %vm252_vm0, %v784_v19  ;;  %760 = vmatmul.msk.bf16.gmra.mxu3 %vm252_vm0, %v792_v20 }
  0x56   :  { %737 = vmatmul.msk.bf16.gmra.mxu0 %vm252_vm0, %v769_v21  ;;  %745 = vmatmul.msk.bf16.gmra.mxu1 %vm252_vm0, %v777_v22 }
  0x57   :  { %753 = vmatmul.msk.bf16.gmra.mxu2 %vm252_vm0, %v785_v23  ;;  %761 = vmatmul.msk.bf16.gmra.mxu3 %vm252_vm0, %v793_v24 }
  0x66   :  { %738 = vmatmul.msk.bf16.gmra.mxu0 %vm252_vm0, %v770_v25  ;;  %746 = vmatmul.msk.bf16.gmra.mxu1 %vm252_vm0, %v778_v26 }
  0x67   :  { %754 = vmatmul.msk.bf16.gmra.mxu2 %vm252_vm0, %v786_v27  ;;  %762 = vmatmul.msk.bf16.gmra.mxu3 %vm252_vm0, %v794_v28 }
  0x76   :  { %739 = vmatmul.msk.bf16.gmra.mxu0 %vm252_vm0, %v771_v29  ;;  %747 = vmatmul.msk.bf16.gmra.mxu1 %vm252_vm0, %v779_v30 }
  0x77   :  { %755 = vmatmul.msk.bf16.gmra.mxu2 %vm252_vm0, %v787_v31  ;;  %763 = vmatmul.msk.bf16.gmra.mxu3 %vm252_vm0, %v795_v32 }
  0x83   :  { %v358_v34 = vpop.f32.mrf.mxu0  ;;  %v398_v35 = vpop.f32.mrf.mxu1 }
  0x84   :  { %v359_v36 = vadd.f32 %v987_v33, %v358_v34  ;;  %v399_v37 = vadd.f32 %v987_v33, %v398_v35 }
  0x86   :  { %518 = vst [vmem:[#allocation2] sm:$0xff] %v359_v36 }
  0x87   :  { %534 = vst [vmem:[#allocation2 + $0x80] sm:$0xff] %v399_v37 }
  0x8a   :  { %v438_v38 = vpop.f32.mrf.mxu2  ;;  %v478_v39 = vpop.f32.mrf.mxu3 }
  0x8b   :  { %v439_v40 = vadd.f32 %v987_v33, %v438_v38  ;;  %v479_v41 = vadd.f32 %v987_v33, %v478_v39  ;;  %v360_v42 = vpop.f32.mrf.mxu0  ;;  %v400_v43 = vpop.f32.mrf.mxu1 }
  0x8c   :  { %v361_v44 = vadd.f32 %v987_v33, %v360_v42  ;;  %v401_v45 = vadd.f32 %v987_v33, %v400_v43 }
  0x8d   :  { %550 = vst [vmem:[#allocation2 + $0x100] sm:$0xff] %v439_v40 }
  0x8e   :  { %566 = vst [vmem:[#allocation2 + $0x180] sm:$0xff] %v479_v41 }
  0x8f   :  { %519 = vst [vmem:[#allocation2 + $0x8] sm:$0xff] %v361_v44 }
  0x90   :  { %535 = vst [vmem:[#allocation2 + $0x88] sm:$0xff] %v401_v45 }
  0x92   :  { %v440_v46 = vpop.f32.mrf.mxu2  ;;  %v480_v47 = vpop.f32.mrf.mxu3 }
  0x93   :  { %v441_v48 = vadd.f32 %v987_v33, %v440_v46  ;;  %v481_v49 = vadd.f32 %v987_v33, %v480_v47  ;;  %v363_v50 = vpop.f32.mrf.mxu0  ;;  %v403_v51 = vpop.f32.mrf.mxu1 }
  0x94   :  { %v364_v52 = vadd.f32 %v987_v33, %v363_v50  ;;  %v404_v53 = vadd.f32 %v987_v33, %v403_v51 }
  0x95   :  { %551 = vst [vmem:[#allocation2 + $0x108] sm:$0xff] %v441_v48 }
  0x96   :  { %567 = vst [vmem:[#allocation2 + $0x188] sm:$0xff] %v481_v49 }
  0x97   :  { %520 = vst [vmem:[#allocation2 + $0x10] sm:$0xff] %v364_v52 }
  0x98   :  { %536 = vst [vmem:[#allocation2 + $0x90] sm:$0xff] %v404_v53 }
  0x9a   :  { %v443_v54 = vpop.f32.mrf.mxu2  ;;  %v483_v55 = vpop.f32.mrf.mxu3 }
  0x9b   :  { %v444_v56 = vadd.f32 %v987_v33, %v443_v54  ;;  %v484_v57 = vadd.f32 %v987_v33, %v483_v55  ;;  %v365_v58 = vpop.f32.mrf.mxu0  ;;  %v405_v59 = vpop.f32.mrf.mxu1 }
  0x9c   :  { %v366_v60 = vadd.f32 %v987_v33, %v365_v58  ;;  %v406_v61 = vadd.f32 %v987_v33, %v405_v59 }
  0x9d   :  { %552 = vst [vmem:[#allocation2 + $0x110] sm:$0xff] %v444_v56 }
  0x9e   :  { %568 = vst [vmem:[#allocation2 + $0x190] sm:$0xff] %v484_v57 }
  0x9f   :  { %521 = vst [vmem:[#allocation2 + $0x18] sm:$0xff] %v366_v60 }
  0xa0   :  { %537 = vst [vmem:[#allocation2 + $0x98] sm:$0xff] %v406_v61 }
  0xa2   :  { %v445_v62 = vpop.f32.mrf.mxu2  ;;  %v485_v63 = vpop.f32.mrf.mxu3 }
  0xa3   :  { %v446_v0 = vadd.f32 %v987_v33, %v445_v62  ;;  %v486_v1 = vadd.f32 %v987_v33, %v485_v63  ;;  %v368_v2 = vpop.f32.mrf.mxu0  ;;  %v408_v3 = vpop.f32.mrf.mxu1 }
  0xa4   :  { %v369_v4 = vadd.f32 %v987_v33, %v368_v2  ;;  %v409_v5 = vadd.f32 %v987_v33, %v408_v3 }
  0xa5   :  { %553 = vst [vmem:[#allocation2 + $0x118] sm:$0xff] %v446_v0 }
  0xa6   :  { %569 = vst [vmem:[#allocation2 + $0x198] sm:$0xff] %v486_v1 }
  0xa7   :  { %522 = vst [vmem:[#allocation2 + $0x20] sm:$0xff] %v369_v4 }
  0xa8   :  { %538 = vst [vmem:[#allocation2 + $0xa0] sm:$0xff] %v409_v5 }
  0xaa   :  { %v448_v6 = vpop.f32.mrf.mxu2  ;;  %v488_v7 = vpop.f32.mrf.mxu3 }
  0xab   :  { %v449_v8 = vadd.f32 %v987_v33, %v448_v6  ;;  %v489_v9 = vadd.f32 %v987_v33, %v488_v7  ;;  %v370_v10 = vpop.f32.mrf.mxu0  ;;  %v410_v11 = vpop.f32.mrf.mxu1 }
  0xac   :  { %v371_v12 = vadd.f32 %v987_v33, %v370_v10  ;;  %v411_v13 = vadd.f32 %v987_v33, %v410_v11 }
  0xad   :  { %554 = vst [vmem:[#allocation2 + $0x120] sm:$0xff] %v449_v8 }
  0xae   :  { %570 = vst [vmem:[#allocation2 + $0x1a0] sm:$0xff] %v489_v9 }
  0xaf   :  { %523 = vst [vmem:[#allocation2 + $0x28] sm:$0xff] %v371_v12 }
  0xb0   :  { %539 = vst [vmem:[#allocation2 + $0xa8] sm:$0xff] %v411_v13 }
  0xb2   :  { %v450_v14 = vpop.f32.mrf.mxu2  ;;  %v490_v15 = vpop.f32.mrf.mxu3 }
  0xb3   :  { %v451_v16 = vadd.f32 %v987_v33, %v450_v14  ;;  %v491_v17 = vadd.f32 %v987_v33, %v490_v15  ;;  %v373_v18 = vpop.f32.mrf.mxu0  ;;  %v413_v19 = vpop.f32.mrf.mxu1 }
  0xb4   :  { %v374_v20 = vadd.f32 %v987_v33, %v373_v18  ;;  %v414_v21 = vadd.f32 %v987_v33, %v413_v19 }
  0xb5   :  { %555 = vst [vmem:[#allocation2 + $0x128] sm:$0xff] %v451_v16 }
  0xb6   :  { %571 = vst [vmem:[#allocation2 + $0x1a8] sm:$0xff] %v491_v17 }
  0xb7   :  { %524 = vst [vmem:[#allocation2 + $0x30] sm:$0xff] %v374_v20 }
  0xb8   :  { %540 = vst [vmem:[#allocation2 + $0xb0] sm:$0xff] %v414_v21 }
  0xba   :  { %v453_v22 = vpop.f32.mrf.mxu2  ;;  %v493_v23 = vpop.f32.mrf.mxu3 }
  0xbb   :  { %v454_v24 = vadd.f32 %v987_v33, %v453_v22  ;;  %v494_v25 = vadd.f32 %v987_v33, %v493_v23  ;;  %v375_v26 = vpop.f32.mrf.mxu0  ;;  %v415_v27 = vpop.f32.mrf.mxu1 }
  0xbc   :  { %v376_v28 = vadd.f32 %v987_v33, %v375_v26  ;;  %v416_v29 = vadd.f32 %v987_v33, %v415_v27 }
  0xbd   :  { %556 = vst [vmem:[#allocation2 + $0x130] sm:$0xff] %v454_v24 }
  0xbe   :  { %572 = vst [vmem:[#allocation2 + $0x1b0] sm:$0xff] %v494_v25 }
  0xbf   :  { %525 = vst [vmem:[#allocation2 + $0x38] sm:$0xff] %v376_v28 }
  0xc0   :  { %541 = vst [vmem:[#allocation2 + $0xb8] sm:$0xff] %v416_v29 }
  0xc2   :  { %v455_v30 = vpop.f32.mrf.mxu2  ;;  %v495_v31 = vpop.f32.mrf.mxu3 }
  0xc3   :  { %v456_v32 = vadd.f32 %v987_v33, %v455_v30  ;;  %v496_v34 = vadd.f32 %v987_v33, %v495_v31  ;;  %v378_v35 = vpop.f32.mrf.mxu0  ;;  %v418_v36 = vpop.f32.mrf.mxu1 }
  0xc4   :  { %v379_v37 = vadd.f32 %v987_v33, %v378_v35  ;;  %v419_v38 = vadd.f32 %v987_v33, %v418_v36 }
  0xc5   :  { %557 = vst [vmem:[#allocation2 + $0x138] sm:$0xff] %v456_v32 }
  0xc6   :  { %573 = vst [vmem:[#allocation2 + $0x1b8] sm:$0xff] %v496_v34 }
  0xc7   :  { %526 = vst [vmem:[#allocation2 + $0x40] sm:$0xff] %v379_v37 }
  0xc8   :  { %542 = vst [vmem:[#allocation2 + $0xc0] sm:$0xff] %v419_v38 }
  0xca   :  { %v458_v39 = vpop.f32.mrf.mxu2  ;;  %v498_v40 = vpop.f32.mrf.mxu3 }
  0xcb   :  { %v459_v41 = vadd.f32 %v987_v33, %v458_v39  ;;  %v499_v42 = vadd.f32 %v987_v33, %v498_v40  ;;  %v380_v43 = vpop.f32.mrf.mxu0  ;;  %v420_v44 = vpop.f32.mrf.mxu1 }
  0xcc   :  { %v381_v45 = vadd.f32 %v987_v33, %v380_v43  ;;  %v421_v46 = vadd.f32 %v987_v33, %v420_v44 }
  0xcd   :  { %558 = vst [vmem:[#allocation2 + $0x140] sm:$0xff] %v459_v41 }
  0xce   :  { %574 = vst [vmem:[#allocation2 + $0x1c0] sm:$0xff] %v499_v42 }
  0xcf   :  { %527 = vst [vmem:[#allocation2 + $0x48] sm:$0xff] %v381_v45 }
  0xd0   :  { %543 = vst [vmem:[#allocation2 + $0xc8] sm:$0xff] %v421_v46 }
  0xd2   :  { %v460_v47 = vpop.f32.mrf.mxu2  ;;  %v500_v48 = vpop.f32.mrf.mxu3 }
  0xd3   :  { %v461_v49 = vadd.f32 %v987_v33, %v460_v47  ;;  %v501_v50 = vadd.f32 %v987_v33, %v500_v48  ;;  %v383_v51 = vpop.f32.mrf.mxu0  ;;  %v423_v52 = vpop.f32.mrf.mxu1 }
  0xd4   :  { %v384_v53 = vadd.f32 %v987_v33, %v383_v51  ;;  %v424_v54 = vadd.f32 %v987_v33, %v423_v52 }
  0xd5   :  { %559 = vst [vmem:[#allocation2 + $0x148] sm:$0xff] %v461_v49 }
  0xd6   :  { %575 = vst [vmem:[#allocation2 + $0x1c8] sm:$0xff] %v501_v50 }
  0xd7   :  { %528 = vst [vmem:[#allocation2 + $0x50] sm:$0xff] %v384_v53 }
  0xd8   :  { %544 = vst [vmem:[#allocation2 + $0xd0] sm:$0xff] %v424_v54 }
  0xda   :  { %v463_v55 = vpop.f32.mrf.mxu2  ;;  %v503_v56 = vpop.f32.mrf.mxu3 }
  0xdb   :  { %v464_v57 = vadd.f32 %v987_v33, %v463_v55  ;;  %v504_v58 = vadd.f32 %v987_v33, %v503_v56  ;;  %v385_v59 = vpop.f32.mrf.mxu0  ;;  %v425_v60 = vpop.f32.mrf.mxu1 }
  0xdc   :  { %v386_v61 = vadd.f32 %v987_v33, %v385_v59  ;;  %v426_v62 = vadd.f32 %v987_v33, %v425_v60 }
  0xdd   :  { %560 = vst [vmem:[#allocation2 + $0x150] sm:$0xff] %v464_v57 }
  0xde   :  { %576 = vst [vmem:[#allocation2 + $0x1d0] sm:$0xff] %v504_v58 }
  0xdf   :  { %529 = vst [vmem:[#allocation2 + $0x58] sm:$0xff] %v386_v61 }
  0xe0   :  { %545 = vst [vmem:[#allocation2 + $0xd8] sm:$0xff] %v426_v62 }
  0xe2   :  { %v465_v63 = vpop.f32.mrf.mxu2  ;;  %v505_v0 = vpop.f32.mrf.mxu3 }
  0xe3   :  { %v466_v1 = vadd.f32 %v987_v33, %v465_v63  ;;  %v506_v2 = vadd.f32 %v987_v33, %v505_v0  ;;  %v388_v3 = vpop.f32.mrf.mxu0  ;;  %v428_v4 = vpop.f32.mrf.mxu1 }
  0xe4   :  { %v389_v5 = vadd.f32 %v987_v33, %v388_v3  ;;  %v429_v6 = vadd.f32 %v987_v33, %v428_v4 }
  0xe5   :  { %561 = vst [vmem:[#allocation2 + $0x158] sm:$0xff] %v466_v1 }
  0xe6   :  { %577 = vst [vmem:[#allocation2 + $0x1d8] sm:$0xff] %v506_v2 }
  0xe7   :  { %530 = vst [vmem:[#allocation2 + $0x60] sm:$0xff] %v389_v5 }
  0xe8   :  { %546 = vst [vmem:[#allocation2 + $0xe0] sm:$0xff] %v429_v6 }
  0xea   :  { %v468_v7 = vpop.f32.mrf.mxu2  ;;  %v508_v8 = vpop.f32.mrf.mxu3 }
  0xeb   :  { %v469_v9 = vadd.f32 %v987_v33, %v468_v7  ;;  %v509_v10 = vadd.f32 %v987_v33, %v508_v8  ;;  %v390_v11 = vpop.f32.mrf.mxu0  ;;  %v430_v12 = vpop.f32.mrf.mxu1 }
  0xec   :  { %v391_v13 = vadd.f32 %v987_v33, %v390_v11  ;;  %v431_v14 = vadd.f32 %v987_v33, %v430_v12 }
  0xed   :  { %562 = vst [vmem:[#allocation2 + $0x160] sm:$0xff] %v469_v9 }
  0xee   :  { %578 = vst [vmem:[#allocation2 + $0x1e0] sm:$0xff] %v509_v10 }
  0xef   :  { %531 = vst [vmem:[#allocation2 + $0x68] sm:$0xff] %v391_v13 }
  0xf0   :  { %547 = vst [vmem:[#allocation2 + $0xe8] sm:$0xff] %v431_v14 }
  0xf2   :  { %v470_v15 = vpop.f32.mrf.mxu2  ;;  %v510_v16 = vpop.f32.mrf.mxu3 }
  0xf3   :  { %v471_v17 = vadd.f32 %v987_v33, %v470_v15  ;;  %v511_v18 = vadd.f32 %v987_v33, %v510_v16  ;;  %v393_v19 = vpop.f32.mrf.mxu0  ;;  %v433_v20 = vpop.f32.mrf.mxu1 }
  0xf4   :  { %v394_v21 = vadd.f32 %v987_v33, %v393_v19  ;;  %v434_v22 = vadd.f32 %v987_v33, %v433_v20 }
  0xf5   :  { %563 = vst [vmem:[#allocation2 + $0x168] sm:$0xff] %v471_v17 }
  0xf6   :  { %579 = vst [vmem:[#allocation2 + $0x1e8] sm:$0xff] %v511_v18 }
  0xf7   :  { %532 = vst [vmem:[#allocation2 + $0x70] sm:$0xff] %v394_v21 }
  0xf8   :  { %548 = vst [vmem:[#allocation2 + $0xf0] sm:$0xff] %v434_v22 }
  0xfa   :  { %v473_v23 = vpop.f32.mrf.mxu2  ;;  %v513_v24 = vpop.f32.mrf.mxu3 }
  0xfb   :  { %v474_v25 = vadd.f32 %v987_v33, %v473_v23  ;;  %v514_v26 = vadd.f32 %v987_v33, %v513_v24  ;;  %v395_v27 = vpop.f32.mrf.mxu0  ;;  %v435_v28 = vpop.f32.mrf.mxu1 }
  0xfc   :  { %v396_v29 = vadd.f32 %v987_v33, %v395_v27  ;;  %v436_v30 = vadd.f32 %v987_v33, %v435_v28 }
  0xfd   :  { %564 = vst [vmem:[#allocation2 + $0x170] sm:$0xff] %v474_v25 }
  0xfe   :  { %580 = vst [vmem:[#allocation2 + $0x1f0] sm:$0xff] %v514_v26 }
  0xff   :  { %533 = vst [vmem:[#allocation2 + $0x78] sm:$0xff] %v396_v29 }
 0x100   :  { %549 = vst [vmem:[#allocation2 + $0xf8] sm:$0xff] %v436_v30 }
 0x102   :  { %v475_v31 = vpop.f32.mrf.mxu2  ;;  %v515_v32 = vpop.f32.mrf.mxu3 }
 0x103   :  { %v476_v34 = vadd.f32 %v987_v33, %v475_v31  ;;  %v516_v35 = vadd.f32 %v987_v33, %v515_v32 }
 0x105   :  { %565 = vst [vmem:[#allocation2 + $0x178] sm:$0xff] %v476_v34 }
 0x106   :  { %581 = vst [vmem:[#allocation2 + $0x1f8] sm:$0xff] %v516_v35 }
 0x107   :  { %594 = dma.vmem_to_hbm [thread:$0]  %s587_s2, 8192, %s589_s25, [#allocation3], %s831_s26, %s831_s26, %s832_s27  }
 0x108   :  { %828 = dma.done.wait [#allocation3], 8192  }
 0x109   :  { %829 = vsyncadd [#allocation3], 4294959104 }
 0x10a   :  { %599 = vsyncpa [#allocation3], 1 }

</bundles_post_ra>
